<compile_context>
chip_gen: v7x
topology: tpu7x:2x2x1
jax: 0.10.0
libtpu: 0.0.40
codegen_flags: <defaults>
</compile_context>

<pallas_src>
import jax
import jax.numpy as jnp
from jax.experimental import pallas as pl
from jax.experimental.pallas import tpu as pltpu


def _round_up(x, m):
    return ((x + m - 1) // m) * m


def _make_mlp_kernel(num_linear):
    """Fused MLP kernel over `num_linear` Linear layers.

    Ref order: x_ref, (w0_ref, b0_ref), (w1_ref, b1_ref), ..., o_ref.
    Matmuls run on the MXU with bf16 inputs and f32 accumulation; bias-add and
    ReLU are done in f32, then the activation is downcast to bf16 for the next
    MXU pass. Every layer except the last is followed by ReLU.
    """

    def kernel(*refs):
        x_ref = refs[0]
        o_ref = refs[-1]
        h = x_ref[...]                                       # bf16 (TB, in)
        for l in range(num_linear):
            w = refs[1 + 2 * l][...]                         # bf16 (in, out)
            b = refs[2 + 2 * l][...]                         # f32  (1, out)
            acc = jnp.dot(h, w, preferred_element_type=jnp.float32) + b
            if l < num_linear - 1:
                acc = jnp.maximum(acc, 0.0)                  # ReLU (f32 epilogue)
                # Dropout(p=0.2) after the first ReLU: identity in eval mode.
                # TODO(synk): training-mode stochastic dropout would use
                #             pltpu.prng_seed + pltpu.prng_random_bits here.
                h = acc.astype(jnp.bfloat16)                 # feed next MXU pass
            else:
                h = acc                                       # keep f32 for output
        o_ref[...] = h.astype(o_ref.dtype)

    return kernel


def fully_connected_forward(x, weights, biases, *, tb=256):
    """Run the fused MLP Pallas kernel.

    Args:
      x:        (B, input_size) float32
      weights:  list of (in_l, out_l) float32 arrays (already transposed)
      biases:   list of (out_l,)  float32 arrays
      tb:       batch tile (rows per grid step); 256 matches v6e/v7x MXU rows.
    Returns:
      (B, output_size) float32
    """
    num_linear = len(weights)
    B, in_size = x.shape
    out_size = weights[-1].shape[1]

    # Lane-dense output: pad the last layer's out dim to a multiple of 128 so
    # the output writeback is an unmasked full-lane store. Sliced off below.
    out_pad = _round_up(out_size, 128)
    if out_pad != out_size:
        weights = weights[:-1] + [jnp.pad(weights[-1], ((0, 0), (0, out_pad - out_size)))]
        biases = biases[:-1] + [jnp.pad(biases[-1], ((0, out_pad - out_size),))]

    # Batch tiling: pad B to a multiple of the batch tile and grid over it.
    tb = min(tb, _round_up(B, 8))
    b_pad = _round_up(B, tb)
    if b_pad != B:
        x = jnp.pad(x, ((0, b_pad - B), (0, 0)))   # pad rows compute on zeros; sliced off

    # bf16 matmul inputs (halves weight DMA); f32 accumulation in the kernel.
    x_bf16 = x.astype(jnp.bfloat16)
    weights_bf16 = [w.astype(jnp.bfloat16) for w in weights]
    biases_2d = [b.reshape(1, -1).astype(jnp.float32) for b in biases]

    params = []
    for w, b in zip(weights_bf16, biases_2d):
        params.extend([w, b])

    grid = (b_pad // tb,)

    in_specs = [pl.BlockSpec((tb, in_size), lambda i: (i, 0))]
    for w, b in zip(weights_bf16, biases_2d):
        # Grid-invariant blocks (constant index_map): Pallas skips re-DMA
        # between consecutive grid steps.
        in_specs.append(pl.BlockSpec(w.shape, lambda i: (0, 0)))
        in_specs.append(pl.BlockSpec(b.shape, lambda i: (0, 0)))
    out_spec = pl.BlockSpec((tb, out_pad), lambda i: (i, 0))

    kernel = _make_mlp_kernel(num_linear)

    # Advisory cost estimate so the XLA scheduler can overlap this small kernel.
    flops = 2 * b_pad * sum(w.shape[0] * w.shape[1] for w in weights_bf16)
    bytes_accessed = (
        x_bf16.size * 2
        + sum(w.size * 2 for w in weights_bf16)
        + sum(b.size * 4 for b in biases_2d)
        + b_pad * out_pad * 4
    )
    cost = pl.CostEstimate(
        flops=flops, transcendentals=0, bytes_accessed=bytes_accessed
    )

    out = pl.pallas_call(
        kernel,
        out_shape=jax.ShapeDtypeStruct((b_pad, out_pad), jnp.float32),
        grid_spec=pltpu.PrefetchScalarGridSpec(
            num_scalar_prefetch=0,
            grid=grid,
            in_specs=in_specs,
            out_specs=out_spec,
        ),
        compiler_params=pltpu.CompilerParams(
            # Batch steps are independent: enables megacore / v7x dual-TC sharding.
            dimension_semantics=("parallel",),
        ),
        cost_estimate=cost,
    )(x_bf16, *params)

    return out[:B, :out_size]


def init_fully_connected_params(key, input_size, output_size, hidden_size, num_layers):
    """Deterministic init mimicking PyTorch nn.Linear default U(-1/sqrt(in), 1/sqrt(in)).

    Returns weights already transposed to (in, out) layout, biases (out,).
    """
    layer_dims = [(input_size, hidden_size)]
    for _ in range(num_layers - 2):
        layer_dims.append((hidden_size, hidden_size))
    layer_dims.append((hidden_size, output_size))

    weights, biases = [], []
    for (fan_in, fan_out) in layer_dims:
        key, kw, kb = jax.random.split(key, 3)
        bound = 1.0 / jnp.sqrt(jnp.float32(fan_in))
        w = jax.random.uniform(kw, (fan_in, fan_out), jnp.float32, -bound, bound)
        b = jax.random.uniform(kb, (fan_out,), jnp.float32, -bound, bound)
        weights.append(w)
        biases.append(b)
    return weights, biases


def _reference_forward_f32(x, weights, biases):
    h = x
    n = len(weights)
    for l, (w, b) in enumerate(zip(weights, biases)):
        h = h @ w + b
        if l < n - 1:
            h = jnp.maximum(h, 0.0)
    return h


def _reference_forward_bf16(x, weights, biases):
    """Matches the kernel's numerics: bf16 matmul inputs, f32 accumulate/epilogue."""
    h = x.astype(jnp.bfloat16)
    n = len(weights)
    for l, (w, b) in enumerate(zip(weights, biases)):
        acc = jnp.dot(h, w.astype(jnp.bfloat16),
                      preferred_element_type=jnp.float32) + b.astype(jnp.float32)
        if l < n - 1:
            acc = jnp.maximum(acc, 0.0)
            h = acc.astype(jnp.bfloat16)
        else:
            h = acc
    return h


if __name__ == "__main__":
    # Shapes consistent with the module: FullyConnected(input_size=32,
    # output_size=16, hidden_size=128, num_layers=4). Batch=512 with a 256-row
    # tile gives a 2-step parallel grid (pipelining + dual-TC on v7x).
    input_size, output_size, hidden_size, num_layers = 32, 16, 128, 4
    batch = 512

    key = jax.random.PRNGKey(0)
    key, kx = jax.random.split(key)
    x = jax.random.normal(kx, (batch, input_size), dtype=jnp.float32)

    weights, biases = init_fully_connected_params(
        key, input_size, output_size, hidden_size, num_layers
    )

    out = fully_connected_forward(x, weights, biases, tb=256)
    out = jax.block_until_ready(out)
    assert out.shape == (batch, output_size)

    # Exact-path check against a reference using identical bf16/f32 numerics.
    ref_bf16 = _reference_forward_bf16(x, weights, biases)
    assert jnp.allclose(out, ref_bf16, atol=1e-3, rtol=1e-3), \
        "mismatch vs bf16-matmul reference"

    # Semantic sanity check against the full-f32 reference (loose tolerance for
    # the bf16 matmul inputs).
    ref_f32 = _reference_forward_f32(x, weights, biases)
    assert jnp.allclose(out, ref_f32, atol=5e-2, rtol=5e-2), \
        "mismatch vs f32 reference beyond bf16 tolerance"

    print("KERNEL_OK")
</pallas_src>

<mosaic_0001>
module attributes {stable_mosaic.version = 11 : i64} {
  func.func @kernel(%arg0: i32, %arg1: memref<256x32xbf16, #tpu.memory_space<vmem>>, %arg2: memref<32x128xbf16, #tpu.memory_space<vmem>>, %arg3: memref<1x128xf32, #tpu.memory_space<vmem>>, %arg4: memref<128x128xbf16, #tpu.memory_space<vmem>>, %arg5: memref<1x128xf32, #tpu.memory_space<vmem>>, %arg6: memref<128x128xbf16, #tpu.memory_space<vmem>>, %arg7: memref<1x128xf32, #tpu.memory_space<vmem>>, %arg8: memref<128x128xbf16, #tpu.memory_space<vmem>>, %arg9: memref<1x128xf32, #tpu.memory_space<vmem>>, %arg10: memref<256x128xf32, #tpu.memory_space<vmem>>) attributes {dimension_semantics = [#tpu.dimension_semantics<parallel>], iteration_bounds = array<i64: 2>, scalar_prefetch = 0 : i64, scratch_operands = 0 : i64, tpu.core_type = #tpu.core_type<tc>, window_params = [{transform_indices = @transform_0, window_bounds = array<i64: 256, 32>}, {pipeline_mode = #tpu.pipeline_mode<synchronous>, transform_indices = @transform_1, window_bounds = array<i64: 32, 128>}, {pipeline_mode = #tpu.pipeline_mode<synchronous>, transform_indices = @transform_2, window_bounds = array<i64: 1, 128>}, {pipeline_mode = #tpu.pipeline_mode<synchronous>, transform_indices = @transform_3, window_bounds = array<i64: 128, 128>}, {pipeline_mode = #tpu.pipeline_mode<synchronous>, transform_indices = @transform_4, window_bounds = array<i64: 1, 128>}, {pipeline_mode = #tpu.pipeline_mode<synchronous>, transform_indices = @transform_5, window_bounds = array<i64: 128, 128>}, {pipeline_mode = #tpu.pipeline_mode<synchronous>, transform_indices = @transform_6, window_bounds = array<i64: 1, 128>}, {pipeline_mode = #tpu.pipeline_mode<synchronous>, transform_indices = @transform_7, window_bounds = array<i64: 128, 128>}, {pipeline_mode = #tpu.pipeline_mode<synchronous>, transform_indices = @transform_8, window_bounds = array<i64: 1, 128>}, {transform_indices = @transform_9, window_bounds = array<i64: 256, 128>}]} {
    %c0 = arith.constant 0 : index
    %c0_0 = arith.constant 0 : index
    %0 = vector.load %arg1[%c0, %c0_0] : memref<256x32xbf16, #tpu.memory_space<vmem>>, vector<256x32xbf16>
    %c0_1 = arith.constant 0 : index
    %c0_2 = arith.constant 0 : index
    %1 = vector.load %arg2[%c0_1, %c0_2] : memref<32x128xbf16, #tpu.memory_space<vmem>>, vector<32x128xbf16>
    %c0_3 = arith.constant 0 : index
    %c0_4 = arith.constant 0 : index
    %2 = vector.load %arg3[%c0_3, %c0_4] : memref<1x128xf32, #tpu.memory_space<vmem>>, vector<1x128xf32>
    %cst = arith.constant dense<0.000000e+00> : vector<256x128xf32>
    %3 = tpu.matmul %0, %1, %cst {dimension_numbers = #tpu.dot_dimension_numbers<[1], [0], [0], [1], [0, 0, 1, 1], [], []>} : vector<256x32xbf16>, vector<32x128xbf16>, vector<256x128xf32> -> vector<256x128xf32>
    %4 = vector.broadcast %2 : vector<1x128xf32> to vector<256x128xf32>
    %5 = arith.addf %3, %4 : vector<256x128xf32>
    %cst_5 = arith.constant 0.000000e+00 : f32
    %6 = vector.broadcast %cst_5 : f32 to vector<256x128xf32>
    %7 = arith.maximumf %5, %6 : vector<256x128xf32>
    %8 = arith.truncf %7 : vector<256x128xf32> to vector<256x128xbf16>
    %c0_6 = arith.constant 0 : index
    %c0_7 = arith.constant 0 : index
    %9 = vector.load %arg4[%c0_6, %c0_7] : memref<128x128xbf16, #tpu.memory_space<vmem>>, vector<128x128xbf16>
    %c0_8 = arith.constant 0 : index
    %c0_9 = arith.constant 0 : index
    %10 = vector.load %arg5[%c0_8, %c0_9] : memref<1x128xf32, #tpu.memory_space<vmem>>, vector<1x128xf32>
    %cst_10 = arith.constant dense<0.000000e+00> : vector<256x128xf32>
    %11 = tpu.matmul %8, %9, %cst_10 {dimension_numbers = #tpu.dot_dimension_numbers<[1], [0], [0], [1], [0, 0, 1, 1], [], []>} : vector<256x128xbf16>, vector<128x128xbf16>, vector<256x128xf32> -> vector<256x128xf32>
    %12 = vector.broadcast %10 : vector<1x128xf32> to vector<256x128xf32>
    %13 = arith.addf %11, %12 : vector<256x128xf32>
    %cst_11 = arith.constant 0.000000e+00 : f32
    %14 = vector.broadcast %cst_11 : f32 to vector<256x128xf32>
    %15 = arith.maximumf %13, %14 : vector<256x128xf32>
    %16 = arith.truncf %15 : vector<256x128xf32> to vector<256x128xbf16>
    %c0_12 = arith.constant 0 : index
    %c0_13 = arith.constant 0 : index
    %17 = vector.load %arg6[%c0_12, %c0_13] : memref<128x128xbf16, #tpu.memory_space<vmem>>, vector<128x128xbf16>
    %c0_14 = arith.constant 0 : index
    %c0_15 = arith.constant 0 : index
    %18 = vector.load %arg7[%c0_14, %c0_15] : memref<1x128xf32, #tpu.memory_space<vmem>>, vector<1x128xf32>
    %cst_16 = arith.constant dense<0.000000e+00> : vector<256x128xf32>
    %19 = tpu.matmul %16, %17, %cst_16 {dimension_numbers = #tpu.dot_dimension_numbers<[1], [0], [0], [1], [0, 0, 1, 1], [], []>} : vector<256x128xbf16>, vector<128x128xbf16>, vector<256x128xf32> -> vector<256x128xf32>
    %20 = vector.broadcast %18 : vector<1x128xf32> to vector<256x128xf32>
    %21 = arith.addf %19, %20 : vector<256x128xf32>
    %cst_17 = arith.constant 0.000000e+00 : f32
    %22 = vector.broadcast %cst_17 : f32 to vector<256x128xf32>
    %23 = arith.maximumf %21, %22 : vector<256x128xf32>
    %24 = arith.truncf %23 : vector<256x128xf32> to vector<256x128xbf16>
    %c0_18 = arith.constant 0 : index
    %c0_19 = arith.constant 0 : index
    %25 = vector.load %arg8[%c0_18, %c0_19] : memref<128x128xbf16, #tpu.memory_space<vmem>>, vector<128x128xbf16>
    %c0_20 = arith.constant 0 : index
    %c0_21 = arith.constant 0 : index
    %26 = vector.load %arg9[%c0_20, %c0_21] : memref<1x128xf32, #tpu.memory_space<vmem>>, vector<1x128xf32>
    %cst_22 = arith.constant dense<0.000000e+00> : vector<256x128xf32>
    %27 = tpu.matmul %24, %25, %cst_22 {dimension_numbers = #tpu.dot_dimension_numbers<[1], [0], [0], [1], [0, 0, 1, 1], [], []>} : vector<256x128xbf16>, vector<128x128xbf16>, vector<256x128xf32> -> vector<256x128xf32>
    %28 = vector.broadcast %26 : vector<1x128xf32> to vector<256x128xf32>
    %29 = arith.addf %27, %28 : vector<256x128xf32>
    %c0_23 = arith.constant 0 : index
    %c0_24 = arith.constant 0 : index
    %30 = vector.load %arg10[%c0_23, %c0_24] : memref<256x128xf32, #tpu.memory_space<vmem>>, vector<256x128xf32>
    tpu.vector_store %arg10[%c0_23, %c0_24], %29 {strides = array<i32>} : memref<256x128xf32, #tpu.memory_space<vmem>>, vector<256x128xf32>,
    return
  }
  func.func @transform_0(%arg0: i32) -> (i32, i32) {
    %c0_i32 = arith.constant 0 : i32
    %c0_i32_0 = arith.constant 0 : i32
    return %arg0, %c0_i32 : i32, i32
  }
  func.func @transform_1(%arg0: i32) -> (i32, i32) {
    %c0_i32 = arith.constant 0 : i32
    %c0_i32_0 = arith.constant 0 : i32
    %c0_i32_1 = arith.constant 0 : i32
    return %c0_i32, %c0_i32_0 : i32, i32
  }
  func.func @transform_2(%arg0: i32) -> (i32, i32) {
    %c0_i32 = arith.constant 0 : i32
    %c0_i32_0 = arith.constant 0 : i32
    %c0_i32_1 = arith.constant 0 : i32
    return %c0_i32, %c0_i32_0 : i32, i32
  }
  func.func @transform_3(%arg0: i32) -> (i32, i32) {
    %c0_i32 = arith.constant 0 : i32
    %c0_i32_0 = arith.constant 0 : i32
    %c0_i32_1 = arith.constant 0 : i32
    return %c0_i32, %c0_i32_0 : i32, i32
  }
  func.func @transform_4(%arg0: i32) -> (i32, i32) {
    %c0_i32 = arith.constant 0 : i32
    %c0_i32_0 = arith.constant 0 : i32
    %c0_i32_1 = arith.constant 0 : i32
    return %c0_i32, %c0_i32_0 : i32, i32
  }
  func.func @transform_5(%arg0: i32) -> (i32, i32) {
    %c0_i32 = arith.constant 0 : i32
    %c0_i32_0 = arith.constant 0 : i32
    %c0_i32_1 = arith.constant 0 : i32
    return %c0_i32, %c0_i32_0 : i32, i32
  }
  func.func @transform_6(%arg0: i32) -> (i32, i32) {
    %c0_i32 = arith.constant 0 : i32
    %c0_i32_0 = arith.constant 0 : i32
    %c0_i32_1 = arith.constant 0 : i32
    return %c0_i32, %c0_i32_0 : i32, i32
  }
  func.func @transform_7(%arg0: i32) -> (i32, i32) {
    %c0_i32 = arith.constant 0 : i32
    %c0_i32_0 = arith.constant 0 : i32
    %c0_i32_1 = arith.constant 0 : i32
    return %c0_i32, %c0_i32_0 : i32, i32
  }
  func.func @transform_8(%arg0: i32) -> (i32, i32) {
    %c0_i32 = arith.constant 0 : i32
    %c0_i32_0 = arith.constant 0 : i32
    %c0_i32_1 = arith.constant 0 : i32
    return %c0_i32, %c0_i32_0 : i32, i32
  }
  func.func @transform_9(%arg0: i32) -> (i32, i32) {
    %c0_i32 = arith.constant 0 : i32
    %c0_i32_0 = arith.constant 0 : i32
    return %arg0, %c0_i32 : i32, i32
  }
}

</mosaic_0001>

<bundles_post_ra>
// kernel: tpu_custom_call.1
= control target key start
LH: loop header
LB: loop body
LE: loop exit
PB: predicated region body
PF: predicated region fallthrough
CT: control target
= control target key end

     0   :  { %14 = vsyncpa [#allocation3], 0  ;;  %s2608_s0 = inlined_call_operand.vmem [shape: bf16[512,32], index: 0, kind: input, shape index: {}]   ;;  %s2609_s1 = inlined_call_operand.vmem [shape: bf16[32,128], index: 1, kind: input, shape index: {}]   ;;  %s2610_s2 = inlined_call_operand.vmem [shape: f32[1,128], index: 2, kind: input, shape index: {}]   ;;  %s2611_s3 = inlined_call_operand.vmem [shape: bf16[128,128], index: 3, kind: input, shape index: {}]   ;;  %s2612_s4 = inlined_call_operand.vmem [shape: f32[1,128], index: 4, kind: input, shape index: {}]   ;;  %s2613_s5 = inlined_call_operand.vmem [shape: bf16[128,128], index: 5, kind: input, shape index: {}]   ;;  %s2614_s6 = inlined_call_operand.vmem [shape: f32[1,128], index: 6, kind: input, shape index: {}]   ;;  %s2615_s7 = inlined_call_operand.vmem [shape: bf16[128,128], index: 7, kind: input, shape index: {}]   ;;  %s2616_s8 = inlined_call_operand.vmem [shape: f32[1,128], index: 8, kind: input, shape index: {}]   ;;  %s2617_s9 = inlined_call_operand.hbm [shape: f32[512,128], index: 9, kind: output, shape index: {}]  }
   0x1   :  { %16 = vsyncpa [#allocation3 + $0x1], 0  ;;  %s2189_s30 = smov 0   ;;  %s2191_s10 = smov 0  }
   0x2   :  { %s2193_s11 = smov 0   ;;  %s2195_s12 = smov 0  }
   0x3 LB: > { %s2210_s13 = sadd.s32 4294967295, %s2134_s12   ;;  %s1628_s14 = sadd.s32 4294967294, %s2134_s12   ;;  %s2134_s12 = sphi %s2195_s12, %s2623_s12   ;;  %s2130_s11 = sphi %s2193_s11, %s2622_s11   ;;  %s2126_s10 = sphi %s2191_s10, %s2621_s10   ;;  %s2122_s30 = sphi %s2189_s30, %s2620_s30  }
   0x4   : > { %s2214_s15 = sadd.s32 1, %s2134_s12   ;;  %s223_s16 = sadd.s32 1, %s2130_s11 }
   0x5   : > { %s220_s17 = ssub.s32 %s2134_s12, %s2214_s15  ;;  %p233_p0 = scmp.ne.s32.totalorder %s2130_s11, %s2126_s10 }
   0x6   : > { %p221_p1 = scmp.eq.s32.totalorder %s220_s17, 0  ;;  %p234_p2 = scmp.eq.s32.totalorder %s2210_s13, 1 }
   0x7   : > { %p239_p3 = scmp.ne.s32.totalorder %s2126_s10, %s2122_s30  ;;  %p240_p4 = scmp.eq.s32.totalorder %s1628_s14, 1 }
   0x8   : > { %s2225_s18 = scalar_select %p221_p1, %s2130_s11, %s223_s16  }
   0x9   : > { %p2227_p5 = por %p234_p2, %p233_p0  ;;  %p2231_p6 = por %p240_p4, %p239_p3 }
   0xa   : > { %p1631_p7 = scmp.ge.s32.totalorder %s2134_s12, 1  ;;  %p291_p8 = scmp.lt.s32.totalorder %s2134_s12, 3 }
   0xc   : > { %p292_p9 = pnand %p1631_p7, %p291_p8 }
   0xd   : > { %v2030_v0 = vld [vmem:[%s2609_s1] sm:$0xff] (!%p292_p9)   ;;  %s1633_s23 = sshll.u32 (!%p292_p9), %s2210_s13, 5  ;;  %v2031_v1 = vld [vmem:[%s2609_s1 + $0x8] sm:$0xff] (!%p292_p9)   ;;  %vm470_vm0 = vcmask (!%p292_p9), 261120   ;;  %v2050_v4 = vld [vmem:[%s2611_s3 + $0x10] sm:$0xff] (!%p292_p9)   ;;  %s324_s25 = sand.u32 (!%p292_p9), 1, %s2126_s10  }
   0xe   : > { %295 = sbr.rel (%p292_p9) target bundleno = 980 (0x3d4), region = 56  ;;  %p328_p10 = scmp.lt.s32.totalorder (!%p292_p9), %s1633_s23, 63  ;;  %1793 = vmatprep.subr.bf16.mxu0 (!%p292_p9), %v2030_v0  ;;  %v2048_v2 = vld [vmem:[%s2611_s3] sm:$0xff] (!%p292_p9)   ;;  %v2049_v3 = vld [vmem:[%s2611_s3 + $0x8] sm:$0xff] (!%p292_p9)   ;;  %v2051_v8 = vld [vmem:[%s2611_s3 + $0x18] sm:$0xff] (!%p292_p9)  }
   0xf   : > { %1794 = vmatpush3.bf16.msra.mxu0 (!%p292_p9), %v2030_v0  ;;  %1829 = vmatprep.subr.bf16.mxu1 (!%p292_p9), %v2048_v2  ;;  %v2052_v9 = vld [vmem:[%s2611_s3 + $0x20] sm:$0xff] (!%p292_p9)   ;;  %v2053_v14 = vld [vmem:[%s2611_s3 + $0x28] sm:$0xff] (!%p292_p9)   ;;  %v2054_v24 = vld [vmem:[%s2611_s3 + $0x30] sm:$0xff] (!%p292_p9)   ;;  %s1702_s29 = sshll.u32 (!%p292_p9), %s2210_s13, 12  ;;  %s2567_s13 = scalar_lea.sflag (!%p292_p9), [#allocation3], %s324_s25 }
  0x10   : > { %1795 = vmatprep.subr.bf16.mxu0 (!%p292_p9), %v2031_v1  ;;  %1830 = vmatpush3.bf16.msra.mxu1 (!%p292_p9), %v2048_v2  ;;  %v2055_v25 = vld [vmem:[%s2611_s3 + $0x38] sm:$0xff] (!%p292_p9)   ;;  %v2056_v26 = vld [vmem:[%s2613_s5] sm:$0xff] (!%p292_p9)   ;;  %v2057_v27 = vld [vmem:[%s2613_s5 + $0x8] sm:$0xff] (!%p292_p9)   ;;  %s2557_s22 = scalar_lea.hbm (!%p292_p9), %s2617_s9, %s1702_s29 }
  0x11   : > { %1831 = vmatprep.subr.bf16.mxu1 (!%p292_p9), %v2049_v3  ;;  %v2058_v28 = vld [vmem:[%s2613_s5 + $0x10] sm:$0xff] (!%p292_p9)   ;;  %v2059_v29 = vld [vmem:[%s2613_s5 + $0x18] sm:$0xff] (!%p292_p9)   ;;  %v2060_v30 = vld [vmem:[%s2613_s5 + $0x20] sm:$0xff] (!%p292_p9)  }
  0x12   : > { %v2061_v31 = vld [vmem:[%s2613_s5 + $0x28] sm:$0xff] (!%p292_p9)   ;;  %v2062_v32 = vld [vmem:[%s2613_s5 + $0x30] sm:$0xff] (!%p292_p9)   ;;  %v2329_v33 = vld [vmem:[%s2610_s2] ss:$0 sm:$0xff] (!%p292_p9) }
  0x13   : > { %1796 = vmatpush3.bf16.msra.mxu0 (!%p292_p9), %v2031_v1 }
  0x14   : > { %1832 = vmatpush3.bf16.msra.mxu1 (!%p292_p9), %v2049_v3  ;;  %1877 = vmatprep.subr.bf16.mxu0 (!%p292_p9), %v2056_v26 }
  0x15   : > { %s2625_s23 = smov (!%p328_p10, %s1633_s23), 63  ;;  %1833 = vmatprep.subr.bf16.mxu1 %v2050_v4 }
  0x16   : > { %s1634_s14 = sshll.u32 %s2625_s23, 2  ;;  %s2136_s23 = smov [#allocation2]  }
  0x17   : > { %s2253_s21 = scalar_lea.vmem %s2608_s0, %s1634_s14 }
  0x18   : > { %v2032_v5 = vld [vmem:[%s2253_s21] sm:$0xff]   ;;  %v2033_v6 = vld [vmem:[%s2253_s21 + $0x8] sm:$0xff]   ;;  %v2034_v7 = vld [vmem:[%s2253_s21 + $0x10] sm:$0xff]   ;;  %1834 = vmatpush3.bf16.msra.mxu1 %v2050_v4 }
  0x19   : > { %1797 = vmatprep.mubr.msk.bf16.mxu0 %vm470_vm0, %v2032_v5  ;;  %v2035_v10 = vld [vmem:[%s2253_s21 + $0x18] sm:$0xff]   ;;  %1835 = vmatprep.subr.bf16.mxu1 %v2051_v8  ;;  %v2036_v11 = vld [vmem:[%s2253_s21 + $0x20] sm:$0xff]   ;;  %v2037_v12 = vld [vmem:[%s2253_s21 + $0x28] sm:$0xff]  }
  0x1a   : > { %1798 = vmatmul.mubr.msk.bf16.vlgmr.msra.gmra.mrb[0].mxu0 %vm470_vm0, %v2033_v6  ;;  %v2038_v13 = vld [vmem:[%s2253_s21 + $0x30] sm:$0xff]   ;;  %v2039_v15 = vld [vmem:[%s2253_s21 + $0x38] sm:$0xff]   ;;  %v2040_v16 = vld [vmem:[%s2253_s21 + $0x40] sm:$0xff]  }
  0x1b   : > { %1801 = vmatprep.mubr.msk.bf16.mxu0 %vm470_vm0, %v2034_v7  ;;  %v2041_v17 = vld [vmem:[%s2253_s21 + $0x48] sm:$0xff]   ;;  %v2042_v18 = vld [vmem:[%s2253_s21 + $0x50] sm:$0xff]   ;;  %v2043_v19 = vld [vmem:[%s2253_s21 + $0x58] sm:$0xff]   ;;  %1878 = vmatpush3.bf16.msra.mxu0 %v2056_v26 }
  0x1c   : > { %1836 = vmatpush3.bf16.msra.mxu1 %v2051_v8  ;;  %v2044_v20 = vld [vmem:[%s2253_s21 + $0x60] sm:$0xff]   ;;  %v2045_v21 = vld [vmem:[%s2253_s21 + $0x68] sm:$0xff]   ;;  %v2046_v22 = vld [vmem:[%s2253_s21 + $0x70] sm:$0xff]   ;;  %1879 = vmatprep.subr.bf16.mxu0 %v2057_v27 }
  0x1d   : > { %1837 = vmatprep.subr.bf16.mxu1 %v2052_v9  ;;  %v2047_v23 = vld [vmem:[%s2253_s21 + $0x78] sm:$0xff]   ;;  %s1632_s21 = sshll.u32 %s324_s25, 8 }
  0x1e   : > { %s2492_s28 = scalar_lea.vmem [#allocation2], %s1632_s21  ;;  %s2076_s21 = sshll.u32 %s2136_s23, 4  ;;  %s2077_s21 = int_to_ptr.vmem [resolvable:$false] %s2076_s21 }
  0x1f   : > { %1880 = vmatpush3.bf16.msra.mxu0 %v2057_v27  ;;  %s1566_s14 = sshll.u32 %s2492_s28, 4  ;;  %s2078_s26 = scalar_lea.vmem %s2077_s21, 8192  ;;  %s2559_s14 = int_to_ptr.vmem [resolvable:$true] %s1566_s14 }
  0x20   : > { %1838 = vmatpush3.bf16.msra.mxu1 %v2052_v9  ;;  %1881 = vmatprep.subr.bf16.mxu0 %v2058_v28  ;;  %s2072_s24 = scalar_lea.vmem %s2559_s14, 4096  ;;  %p2079_p0 = scmp.lt.s32.totalorder %s2559_s14, %s2077_s21 }
  0x21   : > { %1839 = vmatprep.subr.bf16.mxu1 %v2053_v14  ;;  %p2073_p11 = scmp.ne.s32.totalorder %s2559_s14, %s2072_s24  ;;  %p2080_p1 = scmp.lt.s32.totalorder %s2078_s26, %s2072_s24 }
  0x22   : > { %1802 = vmatmul.mubr.msk.bf16.gmra.mrb[4].mxu0 %vm470_vm0, %v2035_v10 }
  0x23   : > { %1805 = vmatprep.mubr.msk.bf16.mxu0 %vm470_vm0, %v2036_v11  ;;  %1882 = vmatpush3.bf16.msra.mxu0 %v2058_v28  ;;  %p2074_p12 = pnand %p2073_p11, %p2227_p5  ;;  %p2081_p2 = por %p2080_p1, %p2079_p0 }
  0x24   : > { %1840 = vmatpush3.bf16.msra.mxu1 %v2053_v14  ;;  %1883 = vmatprep.subr.bf16.mxu0 %v2059_v29 }
  0x25   : > { %1841 = vmatprep.subr.bf16.mxu1 %v2054_v24  ;;  %p2075_p13 = pneg %p2074_p12 }
  0x27   : > { %1884 = vmatpush3.bf16.msra.mxu0 %v2059_v29  ;;  %p2082_p3 = pnand %p2081_p2, %p2075_p13 }
  0x28   : > { %1842 = vmatpush3.bf16.msra.mxu1 %v2054_v24  ;;  %1885 = vmatprep.subr.bf16.mxu0 %v2060_v30 }
  0x29   : > { %1843 = vmatprep.subr.bf16.mxu1 %v2055_v25 }
  0x2a   : > { %1806 = vmatmul.mubr.msk.bf16.gmra.mrb[8].mxu0 %vm470_vm0, %v2037_v12 }
  0x2b   : > { %1809 = vmatprep.mubr.msk.bf16.mxu0 %vm470_vm0, %v2038_v13  ;;  %1886 = vmatpush3.bf16.msra.mxu0 %v2060_v30 }
  0x2c   : > { %1844 = vmatpush3.bf16.msra.mxu1 %v2055_v25  ;;  %1887 = vmatprep.subr.bf16.mxu0 %v2061_v31 }
  0x2f   : > { %1888 = vmatpush3.bf16.msra.mxu0 %v2061_v31 }
  0x30   : > { %1889 = vmatprep.subr.bf16.mxu0 %v2062_v32 }
  0x32   : > { %1810 = vmatmul.mubr.msk.bf16.gmra.mrb[12].mxu0 %vm470_vm0, %v2039_v15 }
  0x33   : > { %1813 = vmatprep.mubr.msk.bf16.mxu0 %vm470_vm0, %v2040_v16  ;;  %1890 = vmatpush3.bf16.msra.mxu0 %v2062_v32 }
  0x3a   : > { %1814 = vmatmul.mubr.msk.bf16.gmra.mrb[16].mxu0 %vm470_vm0, %v2041_v17 }
  0x3b   : > { %1817 = vmatprep.mubr.msk.bf16.mxu0 %vm470_vm0, %v2042_v18 }
  0x42   : > { %1818 = vmatmul.mubr.msk.bf16.gmra.mrb[20].mxu0 %vm470_vm0, %v2043_v19 }
  0x43   : > { %1821 = vmatprep.mubr.msk.bf16.mxu0 %vm470_vm0, %v2044_v20 }
  0x4a   : > { %1822 = vmatmul.mubr.msk.bf16.gmra.mrb[24].mxu0 %vm470_vm0, %v2045_v21 }
  0x4b   : > { %1825 = vmatprep.mubr.msk.bf16.mxu0 %vm470_vm0, %v2046_v22 }
  0x52   : > { %1826 = vmatmul.mubr.msk.bf16.gmra.mrb[28].mxu0 %vm470_vm0, %v2047_v23 }
  0xed   : > { %v1799_v34 = vpop.f32.mrb[0].mxu0 }
  0xee   : > { %v562_v35 = vadd.f32 %v1799_v34, %v2329_v33  ;;  %v553_v36 = vpop.f32.mrb[1].mxu0 }
  0xef   : > { %v554_v37 = vadd.f32 %v2329_v33, %v553_v36  ;;  %v1800_v38 = vpop.f32.mrb[2].mxu0 }
  0xf0   : > { %v565_v39 = vadd.f32 %v1800_v38, %v2329_v33  ;;  %v556_v40 = vpop.f32.mrb[3].mxu0  ;;  %v682_v42 = vmax.f32 %v562_v35, 0.0 }
  0xf1   : > { %v557_v41 = vadd.f32 %v2329_v33, %v556_v40  ;;  %v680_v44 = vmax.f32 %v554_v37, 0.0 }
  0xf2   : > { %v683_v43 = vmax.f32 %v565_v39, 0.0 }
  0xf3   : > { %v681_v45 = vmax.f32 %v557_v41, 0.0 }
  0xf4   : > { %v713_v46 = vpack.c.bf16 %v683_v43, %v682_v42 }
  0xf5   : > { %v1803_v47 = vpop.f32.mrb[4].mxu0  ;;  %v712_v48 = vpack.c.bf16 %v681_v45, %v680_v44 }
  0xf6   : > { %v578_v49 = vadd.f32 %v1803_v47, %v2329_v33  ;;  %v569_v50 = vpop.f32.mrb[5].mxu0 }
  0xf7   : > { %v570_v51 = vadd.f32 %v2329_v33, %v569_v50  ;;  %v1804_v52 = vpop.f32.mrb[6].mxu0  ;;  %1845 = vmatprep.mubr.bf16.mxu1 %v712_v48 }
  0xf8   : > { %v581_v53 = vadd.f32 %v1804_v52, %v2329_v33  ;;  %v572_v54 = vpop.f32.mrb[7].mxu0  ;;  %1846 = vmatmul.mubr.bf16.vlgmr.msra.gmra.mrb[0].mxu1 %v713_v46  ;;  %v686_v56 = vmax.f32 %v578_v49, 0.0 }
  0xf9   : > { %v573_v55 = vadd.f32 %v2329_v33, %v572_v54  ;;  %v684_v58 = vmax.f32 %v570_v51, 0.0 }
  0xfa   : > { %v687_v57 = vmax.f32 %v581_v53, 0.0 }
  0xfb   : > { %v685_v59 = vmax.f32 %v573_v55, 0.0 }
  0xfc   : > { %v715_v60 = vpack.c.bf16 %v687_v57, %v686_v56 }
  0xfd   : > { %v714_v61 = vpack.c.bf16 %v685_v59, %v684_v58  ;;  %v1807_v62 = vpop.f32.mrb[8].mxu0 }
  0xfe   : > { %v594_v63 = vadd.f32 %v1807_v62, %v2329_v33  ;;  %v585_v0 = vpop.f32.mrb[9].mxu0 }
  0xff   : > { %v586_v1 = vadd.f32 %v2329_v33, %v585_v0  ;;  %v1808_v2 = vpop.f32.mrb[10].mxu0  ;;  %1849 = vmatprep.mubr.bf16.mxu1 %v714_v61 }
 0x100   : > { %v597_v3 = vadd.f32 %v1808_v2, %v2329_v33  ;;  %v588_v4 = vpop.f32.mrb[11].mxu0  ;;  %1850 = vmatmul.mubr.bf16.gmra.mrb[4].mxu1 %v715_v60  ;;  %v690_v6 = vmax.f32 %v594_v63, 0.0 }
 0x101   : > { %v589_v5 = vadd.f32 %v2329_v33, %v588_v4  ;;  %v688_v8 = vmax.f32 %v586_v1, 0.0 }
 0x102   : > { %v691_v7 = vmax.f32 %v597_v3, 0.0 }
 0x103   : > { %v689_v9 = vmax.f32 %v589_v5, 0.0 }
 0x104   : > { %v717_v10 = vpack.c.bf16 %v691_v7, %v690_v6 }
 0x105   : > { %v716_v11 = vpack.c.bf16 %v689_v9, %v688_v8  ;;  %v1811_v12 = vpop.f32.mrb[12].mxu0 }
 0x106   : > { %v610_v13 = vadd.f32 %v1811_v12, %v2329_v33  ;;  %v601_v14 = vpop.f32.mrb[13].mxu0 }
 0x107   : > { %v602_v15 = vadd.f32 %v2329_v33, %v601_v14  ;;  %v1812_v16 = vpop.f32.mrb[14].mxu0  ;;  %1853 = vmatprep.mubr.bf16.mxu1 %v716_v11 }
 0x108   : > { %v613_v17 = vadd.f32 %v1812_v16, %v2329_v33  ;;  %v604_v18 = vpop.f32.mrb[15].mxu0  ;;  %1854 = vmatmul.mubr.bf16.gmra.mrb[8].mxu1 %v717_v10  ;;  %v694_v20 = vmax.f32 %v610_v13, 0.0 }
 0x109   : > { %v605_v19 = vadd.f32 %v2329_v33, %v604_v18  ;;  %v692_v22 = vmax.f32 %v602_v15, 0.0 }
 0x10a   : > { %v695_v21 = vmax.f32 %v613_v17, 0.0 }
 0x10b   : > { %v693_v23 = vmax.f32 %v605_v19, 0.0  ;;  %v2063_v19 = vld [vmem:[%s2613_s5 + $0x38] sm:$0xff]  }
 0x10c   : > { %v719_v24 = vpack.c.bf16 %v695_v21, %v694_v20  ;;  %1891 = vmatprep.subr.bf16.mxu0 %v2063_v19  ;;  %v2064_v20 = vld [vmem:[%s2615_s7] sm:$0xff]   ;;  %v2066_v21 = vld [vmem:[%s2615_s7 + $0x10] sm:$0xff]  }
 0x10d   : > { %v718_v25 = vpack.c.bf16 %v693_v23, %v692_v22  ;;  %v1815_v26 = vpop.f32.mrb[16].mxu0  ;;  %1892 = vmatpush3.bf16.msra.mxu0 %v2063_v19  ;;  %1973 = vmatprep.subr.bf16.mxu1 %v2064_v20  ;;  %v2378_v22 = vld [vmem:[%s2615_s7 + $0x18] sm:$0xff]   ;;  %v2384_v23 = vld [vmem:[%s2615_s7 + $0x20] sm:$0xff]  }
 0x10e   : > { %v626_v27 = vadd.f32 %v1815_v26, %v2329_v33  ;;  %v617_v28 = vpop.f32.mrb[17].mxu0  ;;  %1925 = vmatprep.subr.bf16.mxu0 %v2064_v20  ;;  %1981 = vmatpush3.bf16.msra.mxu1 %v2064_v20 }
 0x10f   : > { %v618_v29 = vadd.f32 %v2329_v33, %v617_v28  ;;  %v1816_v30 = vpop.f32.mrb[18].mxu0  ;;  %1857 = vmatprep.mubr.bf16.mxu1 %v718_v25  ;;  %v2399_v25 = vld [vmem:[%s2612_s4] ss:$0 sm:$0xff] }
 0x110   : > { %v629_v31 = vadd.f32 %v1816_v30, %v2329_v33  ;;  %v620_v32 = vpop.f32.mrb[19].mxu0  ;;  %1858 = vmatmul.mubr.bf16.gmra.mrb[12].mxu1 %v719_v24  ;;  %v698_v35 = vmax.f32 %v626_v27, 0.0  ;;  %v2391_v24 = vld [vmem:[%s2615_s7 + $0x28] sm:$0xff]  }
 0x111   : > { %v621_v34 = vadd.f32 %v2329_v33, %v620_v32  ;;  %v696_v37 = vmax.f32 %v618_v29, 0.0 }
 0x112   : > { %v699_v36 = vmax.f32 %v629_v31, 0.0 }
 0x113   : > { %v697_v38 = vmax.f32 %v621_v34, 0.0 }
 0x114   : > { %v721_v39 = vpack.c.bf16 %v699_v36, %v698_v35 }
 0x115   : > { %v720_v40 = vpack.c.bf16 %v697_v38, %v696_v37  ;;  %v1819_v41 = vpop.f32.mrb[20].mxu0 }
 0x116   : > { %v642_v42 = vadd.f32 %v1819_v41, %v2329_v33  ;;  %v633_v43 = vpop.f32.mrb[21].mxu0 }
 0x117   : > { %v634_v44 = vadd.f32 %v2329_v33, %v633_v43  ;;  %v1820_v45 = vpop.f32.mrb[22].mxu0  ;;  %1861 = vmatprep.mubr.bf16.mxu1 %v720_v40 }
 0x118   : > { %v645_v46 = vadd.f32 %v1820_v45, %v2329_v33  ;;  %v636_v47 = vpop.f32.mrb[23].mxu0  ;;  %1862 = vmatmul.mubr.bf16.gmra.mrb[16].mxu1 %v721_v39  ;;  %v702_v49 = vmax.f32 %v642_v42, 0.0 }
 0x119   : > { %v637_v48 = vadd.f32 %v2329_v33, %v636_v47  ;;  %v700_v51 = vmax.f32 %v634_v44, 0.0 }
 0x11a   : > { %v703_v50 = vmax.f32 %v645_v46, 0.0 }
 0x11b   : > { %v701_v52 = vmax.f32 %v637_v48, 0.0 }
 0x11c   : > { %v723_v53 = vpack.c.bf16 %v703_v50, %v702_v49 }
 0x11d   : > { %v722_v54 = vpack.c.bf16 %v701_v52, %v700_v51  ;;  %v1823_v55 = vpop.f32.mrb[24].mxu0 }
 0x11e   : > { %v658_v56 = vadd.f32 %v1823_v55, %v2329_v33  ;;  %v649_v57 = vpop.f32.mrb[25].mxu0 }
 0x11f   : > { %v650_v58 = vadd.f32 %v2329_v33, %v649_v57  ;;  %v1824_v59 = vpop.f32.mrb[26].mxu0  ;;  %1865 = vmatprep.mubr.bf16.mxu1 %v722_v54 }
 0x120   : > { %v661_v60 = vadd.f32 %v1824_v59, %v2329_v33  ;;  %v652_v61 = vpop.f32.mrb[27].mxu0  ;;  %1866 = vmatmul.mubr.bf16.gmra.mrb[20].mxu1 %v723_v53  ;;  %v706_v63 = vmax.f32 %v658_v56, 0.0 }
 0x121   : > { %v653_v62 = vadd.f32 %v2329_v33, %v652_v61  ;;  %v704_v1 = vmax.f32 %v650_v58, 0.0 }
 0x122   : > { %v707_v0 = vmax.f32 %v661_v60, 0.0 }
 0x123   : > { %v705_v2 = vmax.f32 %v653_v62, 0.0 }
 0x124   : > { %v725_v3 = vpack.c.bf16 %v707_v0, %v706_v63 }
 0x125   : > { %v724_v4 = vpack.c.bf16 %v705_v2, %v704_v1  ;;  %v1827_v5 = vpop.f32.mrb[28].mxu0 }
 0x126   : > { %v674_v6 = vadd.f32 %v1827_v5, %v2329_v33  ;;  %v665_v7 = vpop.f32.mrb[29].mxu0 }
 0x127   : > { %v666_v8 = vadd.f32 %v2329_v33, %v665_v7  ;;  %v1828_v9 = vpop.f32.mrb[30].mxu0  ;;  %1869 = vmatprep.mubr.bf16.mxu1 %v724_v4 }
 0x128   : > { %v677_v10 = vadd.f32 %v1828_v9, %v2329_v33  ;;  %v668_v11 = vpop.f32.mrb[31].mxu0  ;;  %1870 = vmatmul.mubr.bf16.gmra.mrb[24].mxu1 %v725_v3  ;;  %v710_v13 = vmax.f32 %v674_v6, 0.0 }
 0x129   : > { %v669_v12 = vadd.f32 %v2329_v33, %v668_v11  ;;  %v708_v15 = vmax.f32 %v666_v8, 0.0  ;;  %v2065_v33 = vld [vmem:[%s2615_s7 + $0x8] sm:$0xff]  }
 0x12a   : > { %v711_v14 = vmax.f32 %v677_v10, 0.0  ;;  %1974 = vmatprep.subr.bf16.mxu1 %v2065_v33 }
 0x12b   : > { %v709_v16 = vmax.f32 %v669_v12, 0.0  ;;  %1982 = vmatpush3.bf16.msra.mxu1 %v2065_v33 }
 0x12c   : > { %v727_v17 = vpack.c.bf16 %v711_v14, %v710_v13  ;;  %1975 = vmatprep.subr.bf16.mxu1 %v2066_v21 }
 0x12d   : > { %v726_v18 = vpack.c.bf16 %v709_v16, %v708_v15 }
 0x12f   : > { %1873 = vmatprep.mubr.bf16.mxu1 %v726_v18  ;;  %1983 = vmatpush3.bf16.msra.mxu1 %v2066_v21 }
 0x130   : > { %1874 = vmatmul.mubr.bf16.gmra.mrb[28].mxu1 %v727_v17  ;;  %1976 = vmatprep.subr.bf16.mxu1 %v2378_v22 }
 0x133   : > { %1984 = vmatpush3.bf16.msra.mxu1 %v2378_v22 }
 0x134   : > { %1977 = vmatprep.subr.bf16.mxu1 %v2384_v23 }
 0x137   : > { %1985 = vmatpush3.bf16.msra.mxu1 %v2384_v23 }
 0x138   : > { %1978 = vmatprep.subr.bf16.mxu1 %v2391_v24 }
 0x13b   : > { %1986 = vmatpush3.bf16.msra.mxu1 %v2391_v24 }
 0x1cb   : > { %v1847_v26 = vpop.f32.mrb[0].mxu1 }
 0x1cc   : > { %v842_v27 = vadd.f32 %v1847_v26, %v2399_v25  ;;  %v833_v28 = vpop.f32.mrb[1].mxu1 }
 0x1cd   : > { %v834_v29 = vadd.f32 %v2399_v25, %v833_v28  ;;  %v1848_v30 = vpop.f32.mrb[2].mxu1 }
 0x1ce   : > { %v845_v31 = vadd.f32 %v1848_v30, %v2399_v25  ;;  %v836_v32 = vpop.f32.mrb[3].mxu1  ;;  %v962_v35 = vmax.f32 %v842_v27, 0.0 }
 0x1cf   : > { %v837_v34 = vadd.f32 %v2399_v25, %v836_v32  ;;  %v960_v37 = vmax.f32 %v834_v29, 0.0 }
 0x1d0   : > { %v963_v36 = vmax.f32 %v845_v31, 0.0 }
 0x1d1   : > { %v961_v38 = vmax.f32 %v837_v34, 0.0 }
 0x1d2   : > { %v993_v39 = vpack.c.bf16 %v963_v36, %v962_v35 }
 0x1d3   : > { %v992_v40 = vpack.c.bf16 %v961_v38, %v960_v37  ;;  %v1851_v41 = vpop.f32.mrb[4].mxu1 }
 0x1d4   : > { %v858_v42 = vadd.f32 %v1851_v41, %v2399_v25  ;;  %v849_v43 = vpop.f32.mrb[5].mxu1 }
 0x1d5   : > { %v850_v44 = vadd.f32 %v2399_v25, %v849_v43  ;;  %v1852_v45 = vpop.f32.mrb[6].mxu1  ;;  %1893 = vmatprep.mubr.bf16.mxu0 %v992_v40 }
 0x1d6   : > { %v861_v46 = vadd.f32 %v1852_v45, %v2399_v25  ;;  %v852_v47 = vpop.f32.mrb[7].mxu1  ;;  %1894 = vmatmul.mubr.bf16.vlgmr.msra.gmra.mrb[32].mxu0 %v993_v39  ;;  %v966_v49 = vmax.f32 %v858_v42, 0.0 }
 0x1d7   : > { %v853_v48 = vadd.f32 %v2399_v25, %v852_v47  ;;  %1926 = vmatpush3.bf16.msra.mxu0 %v2064_v20  ;;  %v964_v51 = vmax.f32 %v850_v44, 0.0 }
 0x1d8   : > { %v967_v50 = vmax.f32 %v861_v46, 0.0  ;;  %1927 = vmatprep.subr.bf16.mxu0 %v2065_v33 }
 0x1d9   : > { %v965_v52 = vmax.f32 %v853_v48, 0.0 }
 0x1da   : > { %v995_v53 = vpack.c.bf16 %v967_v50, %v966_v49 }
 0x1db   : > { %v994_v54 = vpack.c.bf16 %v965_v52, %v964_v51  ;;  %v1855_v55 = vpop.f32.mrb[8].mxu1  ;;  %1928 = vmatpush3.bf16.msra.mxu0 %v2065_v33 }
 0x1dc   : > { %v874_v56 = vadd.f32 %v1855_v55, %v2399_v25  ;;  %v865_v57 = vpop.f32.mrb[9].mxu1  ;;  %1929 = vmatprep.subr.bf16.mxu0 %v2066_v21 }
 0x1dd   : > { %v866_v58 = vadd.f32 %v2399_v25, %v865_v57  ;;  %v1856_v59 = vpop.f32.mrb[10].mxu1  ;;  %1897 = vmatprep.mubr.bf16.mxu0 %v994_v54 }
 0x1de   : > { %v877_v60 = vadd.f32 %v1856_v59, %v2399_v25  ;;  %v868_v61 = vpop.f32.mrb[11].mxu1  ;;  %1898 = vmatmul.mubr.bf16.gmra.mrb[36].mxu0 %v995_v53  ;;  %v970_v63 = vmax.f32 %v874_v56, 0.0 }
 0x1df   : > { %v869_v62 = vadd.f32 %v2399_v25, %v868_v61  ;;  %1930 = vmatpush3.bf16.msra.mxu0 %v2066_v21  ;;  %v968_v1 = vmax.f32 %v866_v58, 0.0 }
 0x1e0   : > { %v971_v0 = vmax.f32 %v877_v60, 0.0  ;;  %1931 = vmatprep.subr.bf16.mxu0 %v2378_v22 }
 0x1e1   : > { %v969_v2 = vmax.f32 %v869_v62, 0.0 }
 0x1e2   : > { %v997_v3 = vpack.c.bf16 %v971_v0, %v970_v63 }
 0x1e3   : > { %v996_v4 = vpack.c.bf16 %v969_v2, %v968_v1  ;;  %v1859_v5 = vpop.f32.mrb[12].mxu1  ;;  %1932 = vmatpush3.bf16.msra.mxu0 %v2378_v22 }
 0x1e4   : > { %v890_v6 = vadd.f32 %v1859_v5, %v2399_v25  ;;  %v881_v7 = vpop.f32.mrb[13].mxu1  ;;  %1933 = vmatprep.subr.bf16.mxu0 %v2384_v23 }
 0x1e5   : > { %v882_v8 = vadd.f32 %v2399_v25, %v881_v7  ;;  %v1860_v9 = vpop.f32.mrb[14].mxu1  ;;  %1901 = vmatprep.mubr.bf16.mxu0 %v996_v4 }
 0x1e6   : > { %v893_v10 = vadd.f32 %v1860_v9, %v2399_v25  ;;  %v884_v11 = vpop.f32.mrb[15].mxu1  ;;  %1902 = vmatmul.mubr.bf16.gmra.mrb[40].mxu0 %v997_v3  ;;  %v974_v13 = vmax.f32 %v890_v6, 0.0 }
 0x1e7   : > { %v885_v12 = vadd.f32 %v2399_v25, %v884_v11  ;;  %1934 = vmatpush3.bf16.msra.mxu0 %v2384_v23  ;;  %v972_v15 = vmax.f32 %v882_v8, 0.0 }
 0x1e8   : > { %v975_v14 = vmax.f32 %v893_v10, 0.0  ;;  %1935 = vmatprep.subr.bf16.mxu0 %v2391_v24 }
 0x1e9   : > { %v973_v16 = vmax.f32 %v885_v12, 0.0  ;;  %v2070_v12 = vld [vmem:[%s2615_s7 + $0x30] sm:$0xff]  }
 0x1ea   : > { %v999_v17 = vpack.c.bf16 %v975_v14, %v974_v13  ;;  %1979 = vmatprep.subr.bf16.mxu1 %v2070_v12  ;;  %v2448_v13 = vld [vmem:[%s2614_s6] ss:$0 sm:$0xff] }
 0x1eb   : > { %v998_v18 = vpack.c.bf16 %v973_v16, %v972_v15  ;;  %v1863_v19 = vpop.f32.mrb[16].mxu1  ;;  %1936 = vmatpush3.bf16.msra.mxu0 %v2391_v24  ;;  %1987 = vmatpush3.bf16.msra.mxu1 %v2070_v12 }
 0x1ec   : > { %v906_v20 = vadd.f32 %v1863_v19, %v2399_v25  ;;  %v897_v33 = vpop.f32.mrb[17].mxu1  ;;  %1937 = vmatprep.subr.bf16.mxu0 %v2070_v12 }
 0x1ed   : > { %v898_v21 = vadd.f32 %v2399_v25, %v897_v33  ;;  %v1864_v22 = vpop.f32.mrb[18].mxu1  ;;  %1905 = vmatprep.mubr.bf16.mxu0 %v998_v18 }
 0x1ee   : > { %v909_v23 = vadd.f32 %v1864_v22, %v2399_v25  ;;  %v900_v26 = vpop.f32.mrb[19].mxu1  ;;  %1906 = vmatmul.mubr.bf16.gmra.mrb[44].mxu0 %v999_v17  ;;  %v978_v28 = vmax.f32 %v906_v20, 0.0 }
 0x1ef   : > { %v901_v27 = vadd.f32 %v2399_v25, %v900_v26  ;;  %v976_v30 = vmax.f32 %v898_v21, 0.0  ;;  %1938 = vmatpush3.bf16.msra.mxu0 %v2070_v12 }
 0x1f0   : > { %v979_v29 = vmax.f32 %v909_v23, 0.0 }
 0x1f1   : > { %v977_v31 = vmax.f32 %v901_v27, 0.0 }
 0x1f2   : > { %v1001_v32 = vpack.c.bf16 %v979_v29, %v978_v28 }
 0x1f3   : > { %v1000_v34 = vpack.c.bf16 %v977_v31, %v976_v30  ;;  %v1867_v24 = vpop.f32.mrb[20].mxu1 }
 0x1f4   : > { %v922_v35 = vadd.f32 %v1867_v24, %v2399_v25  ;;  %v913_v36 = vpop.f32.mrb[21].mxu1 }
 0x1f5   : > { %v914_v37 = vadd.f32 %v2399_v25, %v913_v36  ;;  %v1868_v38 = vpop.f32.mrb[22].mxu1  ;;  %1909 = vmatprep.mubr.bf16.mxu0 %v1000_v34 }
 0x1f6   : > { %v925_v39 = vadd.f32 %v1868_v38, %v2399_v25  ;;  %v916_v40 = vpop.f32.mrb[23].mxu1  ;;  %1910 = vmatmul.mubr.bf16.gmra.mrb[48].mxu0 %v1001_v32  ;;  %v982_v42 = vmax.f32 %v922_v35, 0.0 }
 0x1f7   : > { %v917_v41 = vadd.f32 %v2399_v25, %v916_v40  ;;  %v980_v44 = vmax.f32 %v914_v37, 0.0 }
 0x1f8   : > { %v983_v43 = vmax.f32 %v925_v39, 0.0 }
 0x1f9   : > { %v981_v45 = vmax.f32 %v917_v41, 0.0 }
 0x1fa   : > { %v1003_v46 = vpack.c.bf16 %v983_v43, %v982_v42 }
 0x1fb   : > { %v1002_v47 = vpack.c.bf16 %v981_v45, %v980_v44  ;;  %v1871_v48 = vpop.f32.mrb[24].mxu1 }
 0x1fc   : > { %v938_v49 = vadd.f32 %v1871_v48, %v2399_v25  ;;  %v929_v50 = vpop.f32.mrb[25].mxu1 }
 0x1fd   : > { %v930_v51 = vadd.f32 %v2399_v25, %v929_v50  ;;  %v1872_v52 = vpop.f32.mrb[26].mxu1  ;;  %1913 = vmatprep.mubr.bf16.mxu0 %v1002_v47 }
 0x1fe   : > { %v941_v53 = vadd.f32 %v1872_v52, %v2399_v25  ;;  %v932_v54 = vpop.f32.mrb[27].mxu1  ;;  %1914 = vmatmul.mubr.bf16.gmra.mrb[52].mxu0 %v1003_v46  ;;  %v986_v56 = vmax.f32 %v938_v49, 0.0 }
 0x1ff   : > { %v933_v55 = vadd.f32 %v2399_v25, %v932_v54  ;;  %v984_v58 = vmax.f32 %v930_v51, 0.0 }
 0x200   : > { %v987_v57 = vmax.f32 %v941_v53, 0.0 }
 0x201   : > { %v985_v59 = vmax.f32 %v933_v55, 0.0 }
 0x202   : > { %v1005_v60 = vpack.c.bf16 %v987_v57, %v986_v56 }
 0x203   : > { %v1004_v61 = vpack.c.bf16 %v985_v59, %v984_v58  ;;  %v1875_v62 = vpop.f32.mrb[28].mxu1 }
 0x204   : > { %v954_v63 = vadd.f32 %v1875_v62, %v2399_v25  ;;  %v945_v0 = vpop.f32.mrb[29].mxu1 }
 0x205   : > { %v946_v1 = vadd.f32 %v2399_v25, %v945_v0  ;;  %v1876_v2 = vpop.f32.mrb[30].mxu1  ;;  %1917 = vmatprep.mubr.bf16.mxu0 %v1004_v61 }
 0x206   : > { %v957_v3 = vadd.f32 %v1876_v2, %v2399_v25  ;;  %v948_v4 = vpop.f32.mrb[31].mxu1  ;;  %1918 = vmatmul.mubr.bf16.gmra.mrb[56].mxu0 %v1005_v60  ;;  %v990_v6 = vmax.f32 %v954_v63, 0.0 }
 0x207   : > { %v949_v5 = vadd.f32 %v2399_v25, %v948_v4  ;;  %v988_v8 = vmax.f32 %v946_v1, 0.0  ;;  %v2071_v25 = vld [vmem:[%s2615_s7 + $0x38] sm:$0xff]  }
 0x208   : > { %v991_v7 = vmax.f32 %v957_v3, 0.0  ;;  %1939 = vmatprep.subr.bf16.mxu0 %v2071_v25  ;;  %1980 = vmatprep.subr.bf16.mxu1 %v2071_v25 }
 0x209   : > { %v989_v9 = vmax.f32 %v949_v5, 0.0  ;;  %1940 = vmatpush3.bf16.msra.mxu0 %v2071_v25  ;;  %1988 = vmatpush3.bf16.msra.mxu1 %v2071_v25 }
 0x20a   : > { %v1007_v10 = vpack.c.bf16 %v991_v7, %v990_v6 }
 0x20b   : > { %v1006_v11 = vpack.c.bf16 %v989_v9, %v988_v8 }
 0x20d   : > { %1921 = vmatprep.mubr.bf16.mxu0 %v1006_v11 }
 0x20e   : > { %1922 = vmatmul.mubr.bf16.gmra.mrb[60].mxu0 %v1007_v10 }
 0x2a9   : > { %v1895_v14 = vpop.f32.mrb[32].mxu0 }
 0x2aa   : > { %v1122_v15 = vadd.f32 %v1895_v14, %v2448_v13  ;;  %v1113_v16 = vpop.f32.mrb[33].mxu0 }
 0x2ab   : > { %v1114_v17 = vadd.f32 %v2448_v13, %v1113_v16  ;;  %v1896_v18 = vpop.f32.mrb[34].mxu0 }
 0x2ac   : > { %v1125_v19 = vadd.f32 %v1896_v18, %v2448_v13  ;;  %v1116_v20 = vpop.f32.mrb[35].mxu0  ;;  %v1242_v21 = vmax.f32 %v1122_v15, 0.0 }
 0x2ad   : > { %v1117_v33 = vadd.f32 %v2448_v13, %v1116_v20  ;;  %v1240_v23 = vmax.f32 %v1114_v17, 0.0 }
 0x2ae   : > { %v1243_v22 = vmax.f32 %v1125_v19, 0.0 }
 0x2af   : > { %v1241_v26 = vmax.f32 %v1117_v33, 0.0 }
 0x2b0   : > { %v1273_v27 = vpack.c.bf16 %v1243_v22, %v1242_v21 }
 0x2b1   : > { %v1272_v28 = vpack.c.bf16 %v1241_v26, %v1240_v23  ;;  %v1899_v29 = vpop.f32.mrb[36].mxu0 }
 0x2b2   : > { %v1138_v30 = vadd.f32 %v1899_v29, %v2448_v13  ;;  %v1129_v31 = vpop.f32.mrb[37].mxu0 }
 0x2b3   : > { %v1130_v32 = vadd.f32 %v2448_v13, %v1129_v31  ;;  %v1900_v34 = vpop.f32.mrb[38].mxu0  ;;  %1941 = vmatprep.mubr.bf16.mxu0 %v1272_v28 }
 0x2b4   : > { %v1141_v24 = vadd.f32 %v1900_v34, %v2448_v13  ;;  %v1132_v35 = vpop.f32.mrb[39].mxu0  ;;  %1942 = vmatmul.mubr.bf16.vlgmr.msra.gmra.mrb[64].mxu0 %v1273_v27  ;;  %v1246_v37 = vmax.f32 %v1138_v30, 0.0 }
 0x2b5   : > { %v1133_v36 = vadd.f32 %v2448_v13, %v1132_v35  ;;  %v1244_v39 = vmax.f32 %v1130_v32, 0.0 }
 0x2b6   : > { %v1247_v38 = vmax.f32 %v1141_v24, 0.0 }
 0x2b7   : > { %v1245_v40 = vmax.f32 %v1133_v36, 0.0 }
 0x2b8   : > { %v1275_v41 = vpack.c.bf16 %v1247_v38, %v1246_v37 }
 0x2b9   : > { %v1274_v42 = vpack.c.bf16 %v1245_v40, %v1244_v39  ;;  %v1903_v43 = vpop.f32.mrb[40].mxu0 }
 0x2ba   : > { %v1154_v44 = vadd.f32 %v1903_v43, %v2448_v13  ;;  %v1145_v45 = vpop.f32.mrb[41].mxu0 }
 0x2bb   : > { %v1146_v46 = vadd.f32 %v2448_v13, %v1145_v45  ;;  %v1904_v47 = vpop.f32.mrb[42].mxu0  ;;  %1945 = vmatprep.mubr.bf16.mxu1 %v1274_v42 }
 0x2bc   : > { %v1157_v48 = vadd.f32 %v1904_v47, %v2448_v13  ;;  %v1148_v49 = vpop.f32.mrb[43].mxu0  ;;  %1946 = vmatmul.mubr.bf16.vlgmr.msra.gmra.mrb[32].mxu1 %v1275_v41  ;;  %v1250_v51 = vmax.f32 %v1154_v44, 0.0 }
 0x2bd   : > { %v1149_v50 = vadd.f32 %v2448_v13, %v1148_v49  ;;  %v1248_v53 = vmax.f32 %v1146_v46, 0.0 }
 0x2be   : > { %v1251_v52 = vmax.f32 %v1157_v48, 0.0 }
 0x2bf   : > { %v1249_v54 = vmax.f32 %v1149_v50, 0.0 }
 0x2c0   : > { %v1277_v55 = vpack.c.bf16 %v1251_v52, %v1250_v51 }
 0x2c1   : > { %v1276_v56 = vpack.c.bf16 %v1249_v54, %v1248_v53  ;;  %v1907_v57 = vpop.f32.mrb[44].mxu0 }
 0x2c2   : > { %v1170_v58 = vadd.f32 %v1907_v57, %v2448_v13  ;;  %v1161_v59 = vpop.f32.mrb[45].mxu0 }
 0x2c3   : > { %v1162_v60 = vadd.f32 %v2448_v13, %v1161_v59  ;;  %v1908_v61 = vpop.f32.mrb[46].mxu0  ;;  %1949 = vmatprep.mubr.bf16.mxu1 %v1276_v56 }
 0x2c4   : > { %v1173_v62 = vadd.f32 %v1908_v61, %v2448_v13  ;;  %v1164_v63 = vpop.f32.mrb[47].mxu0  ;;  %1950 = vmatmul.mubr.bf16.gmra.mrb[36].mxu1 %v1277_v55  ;;  %v1254_v1 = vmax.f32 %v1170_v58, 0.0 }
 0x2c5   : > { %v1165_v0 = vadd.f32 %v2448_v13, %v1164_v63  ;;  %v1252_v3 = vmax.f32 %v1162_v60, 0.0 }
 0x2c6   : > { %v1255_v2 = vmax.f32 %v1173_v62, 0.0 }
 0x2c7   : > { %v1253_v4 = vmax.f32 %v1165_v0, 0.0  ;;  %v2488_v0 = vld [vmem:[%s2616_s8] ss:$0 sm:$0xff] }
 0x2c8   : > { %v1279_v5 = vpack.c.bf16 %v1255_v2, %v1254_v1 }
 0x2c9   : > { %v1278_v6 = vpack.c.bf16 %v1253_v4, %v1252_v3  ;;  %v1911_v7 = vpop.f32.mrb[48].mxu0 }
 0x2ca   : > { %v1186_v8 = vadd.f32 %v1911_v7, %v2448_v13  ;;  %v1177_v9 = vpop.f32.mrb[49].mxu0 }
 0x2cb   : > { %v1178_v10 = vadd.f32 %v2448_v13, %v1177_v9  ;;  %v1912_v11 = vpop.f32.mrb[50].mxu0  ;;  %1953 = vmatprep.mubr.bf16.mxu1 %v1278_v6 }
 0x2cc   : > { %v1189_v12 = vadd.f32 %v1912_v11, %v2448_v13  ;;  %v1180_v25 = vpop.f32.mrb[51].mxu0  ;;  %1954 = vmatmul.mubr.bf16.gmra.mrb[40].mxu1 %v1279_v5  ;;  %v1258_v15 = vmax.f32 %v1186_v8, 0.0 }
 0x2cd   : > { %v1181_v14 = vadd.f32 %v2448_v13, %v1180_v25  ;;  %v1256_v17 = vmax.f32 %v1178_v10, 0.0 }
 0x2ce   : > { %v1259_v16 = vmax.f32 %v1189_v12, 0.0 }
 0x2cf   : > { %v1257_v18 = vmax.f32 %v1181_v14, 0.0 }
 0x2d0   : > { %v1281_v19 = vpack.c.bf16 %v1259_v16, %v1258_v15 }
 0x2d1   : > { %v1280_v20 = vpack.c.bf16 %v1257_v18, %v1256_v17  ;;  %v1915_v33 = vpop.f32.mrb[52].mxu0 }
 0x2d2   : > { %v1202_v21 = vadd.f32 %v1915_v33, %v2448_v13  ;;  %v1193_v22 = vpop.f32.mrb[53].mxu0 }
 0x2d3   : > { %v1194_v23 = vadd.f32 %v2448_v13, %v1193_v22  ;;  %v1916_v26 = vpop.f32.mrb[54].mxu0  ;;  %1957 = vmatprep.mubr.bf16.mxu1 %v1280_v20 }
 0x2d4   : > { %v1205_v27 = vadd.f32 %v1916_v26, %v2448_v13  ;;  %v1196_v28 = vpop.f32.mrb[55].mxu0  ;;  %1958 = vmatmul.mubr.bf16.gmra.mrb[44].mxu1 %v1281_v19  ;;  %v1262_v30 = vmax.f32 %v1202_v21, 0.0 }
 0x2d5   : > { %v1197_v29 = vadd.f32 %v2448_v13, %v1196_v28  ;;  %v1260_v32 = vmax.f32 %v1194_v23, 0.0 }
 0x2d6   : > { %v1263_v31 = vmax.f32 %v1205_v27, 0.0 }
 0x2d7   : > { %v1261_v34 = vmax.f32 %v1197_v29, 0.0 }
 0x2d8   : > { %v1283_v24 = vpack.c.bf16 %v1263_v31, %v1262_v30 }
 0x2d9   : > { %v1282_v35 = vpack.c.bf16 %v1261_v34, %v1260_v32  ;;  %v1919_v36 = vpop.f32.mrb[56].mxu0 }
 0x2da   : > { %v1218_v37 = vadd.f32 %v1919_v36, %v2448_v13  ;;  %v1209_v38 = vpop.f32.mrb[57].mxu0 }
 0x2db   : > { %v1210_v39 = vadd.f32 %v2448_v13, %v1209_v38  ;;  %v1920_v40 = vpop.f32.mrb[58].mxu0  ;;  %1961 = vmatprep.mubr.bf16.mxu1 %v1282_v35 }
 0x2dc   : > { %v1221_v41 = vadd.f32 %v1920_v40, %v2448_v13  ;;  %v1212_v42 = vpop.f32.mrb[59].mxu0  ;;  %1962 = vmatmul.mubr.bf16.gmra.mrb[48].mxu1 %v1283_v24  ;;  %v1266_v44 = vmax.f32 %v1218_v37, 0.0 }
 0x2dd   : > { %v1213_v43 = vadd.f32 %v2448_v13, %v1212_v42  ;;  %v1264_v46 = vmax.f32 %v1210_v39, 0.0 }
 0x2de   : > { %v1267_v45 = vmax.f32 %v1221_v41, 0.0 }
 0x2df   : > { %v1265_v47 = vmax.f32 %v1213_v43, 0.0 }
 0x2e0   : > { %v1285_v48 = vpack.c.bf16 %v1267_v45, %v1266_v44 }
 0x2e1   : > { %v1284_v49 = vpack.c.bf16 %v1265_v47, %v1264_v46  ;;  %v1923_v50 = vpop.f32.mrb[60].mxu0 }
 0x2e2   : > { %v1234_v51 = vadd.f32 %v1923_v50, %v2448_v13  ;;  %v1225_v52 = vpop.f32.mrb[61].mxu0 }
 0x2e3   : > { %v1226_v53 = vadd.f32 %v2448_v13, %v1225_v52  ;;  %v1924_v54 = vpop.f32.mrb[62].mxu0  ;;  %1965 = vmatprep.mubr.bf16.mxu1 %v1284_v49 }
 0x2e4   : > { %v1237_v55 = vadd.f32 %v1924_v54, %v2448_v13  ;;  %v1228_v56 = vpop.f32.mrb[63].mxu0  ;;  %1966 = vmatmul.mubr.bf16.gmra.mrb[52].mxu1 %v1285_v48  ;;  %v1270_v58 = vmax.f32 %v1234_v51, 0.0 }
 0x2e5   : > { %v1229_v57 = vadd.f32 %v2448_v13, %v1228_v56  ;;  %v1268_v60 = vmax.f32 %v1226_v53, 0.0 }
 0x2e6   : > { %v1271_v59 = vmax.f32 %v1237_v55, 0.0 }
 0x2e7   : > { %v1269_v61 = vmax.f32 %v1229_v57, 0.0 }
 0x2e8   : > { %v1287_v62 = vpack.c.bf16 %v1271_v59, %v1270_v58 }
 0x2e9   : > { %v1286_v63 = vpack.c.bf16 %v1269_v61, %v1268_v60 }
 0x2eb   : > { %1969 = vmatprep.mubr.bf16.mxu1 %v1286_v63 }
 0x2ec   : > { %1970 = vmatmul.mubr.bf16.gmra.mrb[56].mxu1 %v1287_v62 }
 0x387   : > { %v1943_v1 = vpop.f32.mrb[64].mxu0 }
 0x388   : > { %v1402_v2 = vadd.f32 %v1943_v1, %v2488_v0  ;;  %v1393_v13 = vpop.f32.mrb[65].mxu0 }
 0x389   : > { %v1394_v3 = vadd.f32 %v2488_v0, %v1393_v13  ;;  %v1944_v4 = vpop.f32.mrb[66].mxu0 }
 0x38a   : > { %1522 = vst [vmem:[%s2492_s28 + $0x10] sm:$0xff] %v1402_v2  ;;  %v1405_v5 = vadd.f32 %v1944_v4, %v2488_v0  ;;  %v1396_v6 = vpop.f32.mrb[67].mxu0 }
 0x38b   : > { %1520 = vst [vmem:[%s2492_s28] sm:$0xff] %v1394_v3  ;;  %v1397_v7 = vadd.f32 %v2488_v0, %v1396_v6 }
 0x38c   : > { %1523 = vst [vmem:[%s2492_s28 + $0x18] sm:$0xff] %v1405_v5 }
 0x38d   : > { %1521 = vst [vmem:[%s2492_s28 + $0x8] sm:$0xff] %v1397_v7 }
 0x38f   : > { %v1947_v8 = vpop.f32.mrb[32].mxu1 }
 0x390   : > { %v1418_v9 = vadd.f32 %v1947_v8, %v2488_v0  ;;  %v1409_v10 = vpop.f32.mrb[33].mxu1 }
 0x391   : > { %v1410_v11 = vadd.f32 %v2488_v0, %v1409_v10  ;;  %v1948_v12 = vpop.f32.mrb[34].mxu1 }
 0x392   : > { %1526 = vst [vmem:[%s2492_s28 + $0x30] sm:$0xff] %v1418_v9  ;;  %v1421_v25 = vadd.f32 %v1948_v12, %v2488_v0  ;;  %v1412_v14 = vpop.f32.mrb[35].mxu1 }
 0x393   : > { %1524 = vst [vmem:[%s2492_s28 + $0x20] sm:$0xff] %v1410_v11  ;;  %v1413_v15 = vadd.f32 %v2488_v0, %v1412_v14 }
 0x394   : > { %1527 = vst [vmem:[%s2492_s28 + $0x38] sm:$0xff] %v1421_v25 }
 0x395   : > { %1525 = vst [vmem:[%s2492_s28 + $0x28] sm:$0xff] %v1413_v15 }
 0x397   : > { %v1951_v16 = vpop.f32.mrb[36].mxu1 }
 0x398   : > { %v1434_v17 = vadd.f32 %v1951_v16, %v2488_v0  ;;  %v1425_v18 = vpop.f32.mrb[37].mxu1 }
 0x399   : > { %v1426_v19 = vadd.f32 %v2488_v0, %v1425_v18  ;;  %v1952_v20 = vpop.f32.mrb[38].mxu1 }
 0x39a   : > { %1530 = vst [vmem:[%s2492_s28 + $0x50] sm:$0xff] %v1434_v17  ;;  %v1437_v33 = vadd.f32 %v1952_v20, %v2488_v0  ;;  %v1428_v21 = vpop.f32.mrb[39].mxu1 }
 0x39b   : > { %1528 = vst [vmem:[%s2492_s28 + $0x40] sm:$0xff] %v1426_v19  ;;  %v1429_v22 = vadd.f32 %v2488_v0, %v1428_v21 }
 0x39c   : > { %1531 = vst [vmem:[%s2492_s28 + $0x58] sm:$0xff] %v1437_v33 }
 0x39d   : > { %1529 = vst [vmem:[%s2492_s28 + $0x48] sm:$0xff] %v1429_v22 }
 0x39f   : > { %v1955_v23 = vpop.f32.mrb[40].mxu1 }
 0x3a0   : > { %v1450_v26 = vadd.f32 %v1955_v23, %v2488_v0  ;;  %v1441_v27 = vpop.f32.mrb[41].mxu1 }
 0x3a1   : > { %v1442_v28 = vadd.f32 %v2488_v0, %v1441_v27  ;;  %v1956_v29 = vpop.f32.mrb[42].mxu1 }
 0x3a2   : > { %1534 = vst [vmem:[%s2492_s28 + $0x70] sm:$0xff] %v1450_v26  ;;  %v1453_v30 = vadd.f32 %v1956_v29, %v2488_v0  ;;  %v1444_v31 = vpop.f32.mrb[43].mxu1 }
 0x3a3   : > { %1532 = vst [vmem:[%s2492_s28 + $0x60] sm:$0xff] %v1442_v28  ;;  %v1445_v32 = vadd.f32 %v2488_v0, %v1444_v31 }
 0x3a4   : > { %1535 = vst [vmem:[%s2492_s28 + $0x78] sm:$0xff] %v1453_v30 }
 0x3a5   : > { %1533 = vst [vmem:[%s2492_s28 + $0x68] sm:$0xff] %v1445_v32 }
 0x3a7   : > { %v1959_v34 = vpop.f32.mrb[44].mxu1 }
 0x3a8   : > { %v1466_v24 = vadd.f32 %v1959_v34, %v2488_v0  ;;  %v1457_v35 = vpop.f32.mrb[45].mxu1 }
 0x3a9   : > { %v1458_v36 = vadd.f32 %v2488_v0, %v1457_v35  ;;  %v1960_v37 = vpop.f32.mrb[46].mxu1 }
 0x3aa   : > { %1538 = vst [vmem:[%s2492_s28 + $0x90] sm:$0xff] %v1466_v24  ;;  %v1469_v38 = vadd.f32 %v1960_v37, %v2488_v0  ;;  %v1460_v39 = vpop.f32.mrb[47].mxu1 }
 0x3ab   : > { %1536 = vst [vmem:[%s2492_s28 + $0x80] sm:$0xff] %v1458_v36  ;;  %v1461_v40 = vadd.f32 %v2488_v0, %v1460_v39 }
 0x3ac   : > { %1539 = vst [vmem:[%s2492_s28 + $0x98] sm:$0xff] %v1469_v38 }
 0x3ad   : > { %1537 = vst [vmem:[%s2492_s28 + $0x88] sm:$0xff] %v1461_v40 }
 0x3af   : > { %v1963_v41 = vpop.f32.mrb[48].mxu1 }
 0x3b0   : > { %v1482_v42 = vadd.f32 %v1963_v41, %v2488_v0  ;;  %v1473_v43 = vpop.f32.mrb[49].mxu1 }
 0x3b1   : > { %v1474_v44 = vadd.f32 %v2488_v0, %v1473_v43  ;;  %v1964_v45 = vpop.f32.mrb[50].mxu1 }
 0x3b2   : > { %1542 = vst [vmem:[%s2492_s28 + $0xb0] sm:$0xff] %v1482_v42  ;;  %v1485_v46 = vadd.f32 %v1964_v45, %v2488_v0  ;;  %v1476_v47 = vpop.f32.mrb[51].mxu1 }
 0x3b3   : > { %1540 = vst [vmem:[%s2492_s28 + $0xa0] sm:$0xff] %v1474_v44  ;;  %v1477_v48 = vadd.f32 %v2488_v0, %v1476_v47 }
 0x3b4   : > { %1543 = vst [vmem:[%s2492_s28 + $0xb8] sm:$0xff] %v1485_v46 }
 0x3b5   : > { %1541 = vst [vmem:[%s2492_s28 + $0xa8] sm:$0xff] %v1477_v48 }
 0x3b7   : > { %v1967_v49 = vpop.f32.mrb[52].mxu1 }
 0x3b8   : > { %v1498_v50 = vadd.f32 %v1967_v49, %v2488_v0  ;;  %v1489_v51 = vpop.f32.mrb[53].mxu1 }
 0x3b9   : > { %v1490_v52 = vadd.f32 %v2488_v0, %v1489_v51  ;;  %v1968_v53 = vpop.f32.mrb[54].mxu1 }
 0x3ba   : > { %1546 = vst [vmem:[%s2492_s28 + $0xd0] sm:$0xff] %v1498_v50  ;;  %v1501_v54 = vadd.f32 %v1968_v53, %v2488_v0  ;;  %v1492_v55 = vpop.f32.mrb[55].mxu1 }
 0x3bb   : > { %1544 = vst [vmem:[%s2492_s28 + $0xc0] sm:$0xff] %v1490_v52  ;;  %v1493_v56 = vadd.f32 %v2488_v0, %v1492_v55 }
 0x3bc   : > { %1547 = vst [vmem:[%s2492_s28 + $0xd8] sm:$0xff] %v1501_v54 }
 0x3bd   : > { %1545 = vst [vmem:[%s2492_s28 + $0xc8] sm:$0xff] %v1493_v56 }
 0x3bf   : > { %v1971_v57 = vpop.f32.mrb[56].mxu1 }
 0x3c0   : > { %v1514_v58 = vadd.f32 %v1971_v57, %v2488_v0  ;;  %v1505_v59 = vpop.f32.mrb[57].mxu1 }
 0x3c1   : > { %v1506_v60 = vadd.f32 %v2488_v0, %v1505_v59  ;;  %v1972_v61 = vpop.f32.mrb[58].mxu1 }
 0x3c2   : > { %1550 = vst [vmem:[%s2492_s28 + $0xf0] sm:$0xff] %v1514_v58  ;;  %v1517_v62 = vadd.f32 %v1972_v61, %v2488_v0  ;;  %v1508_v63 = vpop.f32.mrb[59].mxu1 }
 0x3c3   : > { %1548 = vst [vmem:[%s2492_s28 + $0xe0] sm:$0xff] %v1506_v60  ;;  %v1509_v1 = vadd.f32 %v2488_v0, %v1508_v63 }
 0x3c4   : > { %1551 = vst [vmem:[%s2492_s28 + $0xf8] sm:$0xff] %v1517_v62 }
 0x3c5   : > { %1549 = vst [vmem:[%s2492_s28 + $0xe8] sm:$0xff] %v1509_v1 }
 0x3c6   : > { %2085 = shalt.err (!%p2082_p3)
}
 0x3c7   : > { %s2086_s25 = scalar_lea.hbm %s2557_s22, 4096  ;;  %s2090_s29 = scalar_lea.hbm %s2617_s9, 8192 }
 0x3c8   : > { %p2087_p4 = scmp.ne.s32.totalorder %s2557_s22, %s2086_s25  ;;  %p2091_p9 = scmp.lt.u32.totalorder %s2557_s22, %s2617_s9 }
 0x3c9   : > { %p2092_p10 = scmp.lt.u32.totalorder %s2090_s29, %s2086_s25  ;;  %p2094_p12 = scmp.lt.u32.totalorder %s2086_s25, %s2557_s22 }
 0x3ca   : > { %p2088_p7 = pnand %p2087_p4, %p2227_p5 }
 0x3cb   : > { %p2093_p11 = por %p2092_p10, %p2091_p9 }
 0x3cc   : > { %p2089_p8 = pneg %p2088_p7 }
 0x3cd   : > { %p2095_p13 = por %p2094_p12, %p2093_p11 }
 0x3cf   : > { %p2096_p0 = pnand %p2095_p13, %p2089_p8 }
 0x3d1   : > { %2099 = shalt.err (!%p2096_p0)
}
 0x3d2   : > { %s2137_s24 = smov 128   ;;  %s2138_s23 = smov 8  }
 0x3d3   : > { %1989 = dma.vmem_to_hbm [thread:$0]  (%p2227_p5), %s2559_s14, 4096, %s2557_s22, %s2567_s13, %s2137_s24, %s2137_s24, %s2138_s23  }
 0x3d4 PF: > { %p1995_p1 = scmp.ge.s32.totalorder %s2134_s12, 2  ;;  %s1581_s21 = sand.u32 1, %s2122_s30  }
 0x3d5   : > { %s1582_s26 = scalar_lea.sflag [#allocation3], %s1581_s21 }
 0x3d6   : > { %p1992_p2 = pnand %p1995_p1, %p2231_p6 }
 0x3d8   : > { %2117 = dma.done.wait (!%p1992_p2), %s1582_s26, 4096  }
 0x3d9   : > { %2119 = vsyncadd (!%p1992_p2), %s1582_s26, 4294963200  ;;  %p19_p3 = scmp.ge.s32.totalorder %s2214_s15, 4   ;;  %s2620_s30 = smov %s2126_s10 }
 0x3da   : > { %s2621_s10 = smov %s2130_s11  ;;  %s2622_s11 = smov %s2225_s18 }
 0x3db   : > { %s2623_s12 = smov %s2214_s15  ;;  %21 = sbr.rel (!%p19_p3) target bundleno = 3 (0x3), region = 91 }
 0x3e2   :  { %1587 = vsyncpa [#allocation3], 1 }
 0x3e3   :  { %1589 = vsyncpa [#allocation3 + $0x1], 1 }

</bundles_post_ra>
